<compile_context>
chip_gen: v5e
topology: v5e:2x2
jax: 0.10.0
libtpu: 0.0.40
codegen_flags: <defaults>
</compile_context>

<pallas_src>
import functools

import jax
import jax.numpy as jnp
from jax.experimental import pallas as pl
from jax.experimental.pallas import tpu as pltpu

EPS = 1e-5
LANE = 128


def _bn_train(h, gamma, beta):
    """BatchNorm1d training-mode forward (biased variance), single sweep."""
    mean = jnp.mean(h, axis=0, keepdims=True)
    hc = h - mean
    var = jnp.mean(hc * hc, axis=0, keepdims=True)
    scale = jax.lax.rsqrt(var + EPS) * gamma      # fold gamma into the scale
    return hc * scale + beta


def _residual_mlp_kernel(x_ref,
                         w_in_ref, b_in_ref, g_in_ref, be_in_ref,
                         wblk_ref, vblk_ref,
                         w_out_ref, b_out_ref,
                         o_ref,
                         h_ref):
    """grid=(num_blocks,): step i runs residual block i; the stem is fused into
    step 0 and the head into the last step.  h_ref (VMEM scratch) carries the
    activation across steps; per-block weights are streamed per grid step."""
    i = pl.program_id(0)
    last = pl.num_programs(0) - 1

    # ---- stem: Linear(input, width) -> ReLU -> BatchNorm1d (step 0 only) ----
    @pl.when(i == 0)
    def _stem():
        h = jnp.dot(x_ref[...], w_in_ref[...],
                    preferred_element_type=jnp.float32) + b_in_ref[...]
        h = jnp.maximum(h, 0.0)
        h_ref[...] = _bn_train(h, g_in_ref[...], be_in_ref[...])

    # ---- residual block i: h + BN(ReLU(Lin(BN(ReLU(Lin(h)))))) ----
    vb = vblk_ref[0]                               # (8, W) f32: packed vectors
    b1, g1, be1 = vb[0:1], vb[1:2], vb[2:3]
    b2, g2, be2 = vb[3:4], vb[4:5], vb[5:6]

    h = h_ref[...]
    r = jnp.dot(h.astype(jnp.bfloat16), wblk_ref[0, 0],
                preferred_element_type=jnp.float32) + b1
    r = jnp.maximum(r, 0.0)
    r = _bn_train(r, g1, be1)
    r = jnp.dot(r.astype(jnp.bfloat16), wblk_ref[0, 1],
                preferred_element_type=jnp.float32) + b2
    r = jnp.maximum(r, 0.0)
    r = _bn_train(r, g2, be2)
    h_ref[...] = h + r

    # ---- head: Linear(width, output) (last step only) ----
    @pl.when(i == last)
    def _head():
        out = jnp.dot(h_ref[...].astype(jnp.bfloat16), w_out_ref[...],
                      preferred_element_type=jnp.float32) + b_out_ref[...]
        o_ref[...] = out.astype(o_ref.dtype)


# ----------------------------- host-side wrapper -------------------------------


def _round_up(n, m):
    return ((n + m - 1) // m) * m


def _pad_axis(a, axis, new_size, value=0.0):
    pad = new_size - a.shape[axis]
    if pad == 0:
        return a
    widths = [(0, 0)] * a.ndim
    widths[axis] = (0, pad)
    return jnp.pad(a, widths, constant_values=value)


@functools.partial(jax.jit, static_argnames=("num_blocks",))
def residual_mlp(x, params, num_blocks):
    # num_blocks == 0 (stem+head only) would need a separate single-step path.
    assert num_blocks >= 1, "kernel requires at least one residual block"
    batch, input_size = x.shape
    width = params["w_in"].shape[1]
    output_size = params["w_out"].shape[1]

    in_p = _round_up(input_size, LANE)
    width_p = _round_up(width, LANE)
    out_p = _round_up(output_size, LANE)

    # Zero padding is exact: padded input features are 0, padded weight
    # rows/cols are 0, padded BN features stay identically 0 (mean 0, var 0,
    # beta 0) through every layer, and padded output columns are sliced off.
    x_p = _pad_axis(x, 1, in_p).astype(jnp.bfloat16)

    def pad_w(w, rows, cols):
        return _pad_axis(_pad_axis(w, w.ndim - 2, rows), w.ndim - 1, cols)

    w_in = pad_w(params["w_in"], in_p, width_p).astype(jnp.bfloat16)
    b_in = _pad_axis(params["b_in"], 1, width_p)
    g_in = _pad_axis(params["g_in"], 1, width_p, 1.0)
    be_in = _pad_axis(params["be_in"], 1, width_p)

    # Pack the two per-block weights into one streamed tensor: (nb, 2, W, W).
    w_blk = jnp.stack(
        [pad_w(params["w1"], width_p, width_p),
         pad_w(params["w2"], width_p, width_p)],
        axis=1).astype(jnp.bfloat16)

    # Pack the six per-block vectors into one streamed tensor: (nb, 8, W).
    # Rows: [b1, g1, be1, b2, g2, be2, 0, 0] (padded to 8 sublanes).
    zeros_row = jnp.zeros((num_blocks, 1, width_p), jnp.float32)
    v_blk = jnp.concatenate(
        [_pad_axis(params["b1"], 2, width_p),
         _pad_axis(params["g1"], 2, width_p, 1.0),
         _pad_axis(params["be1"], 2, width_p),
         _pad_axis(params["b2"], 2, width_p),
         _pad_axis(params["g2"], 2, width_p, 1.0),
         _pad_axis(params["be2"], 2, width_p),
         zeros_row, zeros_row],
        axis=1)

    w_out = pad_w(params["w_out"], width_p, out_p).astype(jnp.bfloat16)
    b_out = _pad_axis(params["b_out"], 1, out_p)

    grid_spec = pltpu.PrefetchScalarGridSpec(
        num_scalar_prefetch=0,
        grid=(num_blocks,),
        in_specs=[
            pl.BlockSpec((batch, in_p), lambda i: (0, 0)),        # x (bf16)
            pl.BlockSpec((in_p, width_p), lambda i: (0, 0)),      # w_in
            pl.BlockSpec((1, width_p), lambda i: (0, 0)),         # b_in
            pl.BlockSpec((1, width_p), lambda i: (0, 0)),         # g_in
            pl.BlockSpec((1, width_p), lambda i: (0, 0)),         # be_in
            pl.BlockSpec((1, 2, width_p, width_p),
                         lambda i: (i, 0, 0, 0)),                 # w_blk (streamed)
            pl.BlockSpec((1, 8, width_p), lambda i: (i, 0, 0)),   # v_blk (streamed)
            pl.BlockSpec((width_p, out_p), lambda i: (0, 0)),     # w_out
            pl.BlockSpec((1, out_p), lambda i: (0, 0)),           # b_out
        ],
        out_specs=pl.BlockSpec((batch, out_p), lambda i: (0, 0)),
        scratch_shapes=[pltpu.VMEM((batch, width_p), jnp.float32)],  # resident h
    )

    # Advisory cost estimate for the XLA scheduler.
    flops = 2 * batch * (in_p * width_p
                         + 2 * num_blocks * width_p * width_p
                         + width_p * out_p)
    bytes_accessed = (x_p.size * 2
                      + (w_in.size + w_blk.size + w_out.size) * 2
                      + (b_in.size + g_in.size + be_in.size
                         + v_blk.size + b_out.size) * 4
                      + batch * out_p * 4)
    cost = pl.CostEstimate(flops=flops,
                           transcendentals=(1 + 2 * num_blocks) * width_p,
                           bytes_accessed=bytes_accessed)

    # Explicit VMEM budget: resident tensors once, streamed per-block tensors
    # double-buffered, plus headroom; capped at 64 MiB so it is v7x-safe.
    resident_bytes = (x_p.size * 2 + w_in.size * 2 + w_out.size * 2
                      + (b_in.size + g_in.size + be_in.size + b_out.size) * 4
                      + batch * out_p * 4          # output block
                      + batch * width_p * 4)       # h scratch
    streamed_bytes = 2 * (2 * width_p * width_p * 2 + 8 * width_p * 4)
    vmem_limit = int(min(max(2 * (resident_bytes + streamed_bytes) + (4 << 20),
                             32 << 20),
                         64 << 20))

    # NOTE(v7x): BatchNorm couples all batch rows, so this kernel is not split
    # across TensorCores; run independent batches per core for a 2x if needed.
    compiler_params = pltpu.CompilerParams(
        dimension_semantics=("arbitrary",),     # h is carried across block steps
        vmem_limit_bytes=vmem_limit,
    )

    out_padded = pl.pallas_call(
        _residual_mlp_kernel,
        out_shape=jax.ShapeDtypeStruct((batch, out_p), jnp.float32),
        grid_spec=grid_spec,
        compiler_params=compiler_params,
        cost_estimate=cost,
    )(x_p, w_in, b_in, g_in, be_in, w_blk, v_blk, w_out, b_out)

    return out_padded[:, :output_size]


# ---------------- parameter init (deterministic, PyTorch-style uniform) --------


def _linear_params(key, fan_in, fan_out):
    kw, kb = jax.random.split(key)
    bound = 1.0 / jnp.sqrt(fan_in)
    # stored transposed: [in, out] so the kernel computes x @ W
    w = jax.random.uniform(kw, (fan_in, fan_out), jnp.float32, -bound, bound)
    b = jax.random.uniform(kb, (1, fan_out), jnp.float32, -bound, bound)
    return w, b


def init_params(key, num_blocks, width, input_size, output_size):
    keys = jax.random.split(key, 2 + num_blocks)
    w_in, b_in = _linear_params(keys[0], input_size, width)
    w_out, b_out = _linear_params(keys[1], width, output_size)

    w1, b1, w2, b2 = [], [], [], []
    for i in range(num_blocks):
        ka, kb = jax.random.split(keys[2 + i])
        wa, ba = _linear_params(ka, width, width)
        wb, bb = _linear_params(kb, width, width)
        w1.append(wa); b1.append(ba); w2.append(wb); b2.append(bb)

    ones = jnp.ones((1, width), jnp.float32)
    zeros = jnp.zeros((1, width), jnp.float32)
    return dict(
        w_in=w_in, b_in=b_in, g_in=ones, be_in=zeros,
        w1=jnp.stack(w1), b1=jnp.stack(b1),
        g1=jnp.broadcast_to(ones, (num_blocks, 1, width)),
        be1=jnp.broadcast_to(zeros, (num_blocks, 1, width)),
        w2=jnp.stack(w2), b2=jnp.stack(b2),
        g2=jnp.broadcast_to(ones, (num_blocks, 1, width)),
        be2=jnp.broadcast_to(zeros, (num_blocks, 1, width)),
        w_out=w_out, b_out=b_out,
    )


# ---------------- pure-JAX reference for verification ---------------------------


def residual_mlp_ref(x, p, num_blocks, matmul_dtype=jnp.float32):
    def mm(a, w):
        return jnp.dot(a.astype(matmul_dtype), w.astype(matmul_dtype),
                       preferred_element_type=jnp.float32)

    def bn(h, g, b):
        m = jnp.mean(h, axis=0, keepdims=True)
        hc = h - m
        v = jnp.mean(hc * hc, axis=0, keepdims=True)
        return hc * jax.lax.rsqrt(v + EPS) * g + b

    h = bn(jnp.maximum(mm(x, p["w_in"]) + p["b_in"], 0.0), p["g_in"], p["be_in"])
    for i in range(num_blocks):
        r = bn(jnp.maximum(mm(h, p["w1"][i]) + p["b1"][i], 0.0), p["g1"][i], p["be1"][i])
        r = bn(jnp.maximum(mm(r, p["w2"][i]) + p["b2"][i], 0.0), p["g2"][i], p["be2"][i])
        h = h + r
    return mm(h, p["w_out"]) + p["b_out"]


if __name__ == "__main__":
    num_blocks = 3
    batch, input_size, width, output_size = 64, 64, 128, 32

    key = jax.random.PRNGKey(0)
    kp, kx = jax.random.split(key)
    params = init_params(kp, num_blocks, width, input_size, output_size)
    x = jax.random.normal(kx, (batch, input_size), jnp.float32)

    out = jax.block_until_ready(residual_mlp(x, params, num_blocks=num_blocks))
    assert out.shape == (batch, output_size)

    # Tight check vs a reference that uses the same bf16-operand matmuls.
    ref_bf16 = residual_mlp_ref(x, params, num_blocks, matmul_dtype=jnp.bfloat16)
    assert jnp.allclose(out, ref_bf16, atol=2e-3, rtol=2e-3), \
        "mismatch vs bf16-matched reference"

    # Looser sanity check vs the full-f32 spec reference (bf16 matmul rounding).
    ref_f32 = residual_mlp_ref(x, params, num_blocks, matmul_dtype=jnp.float32)
    assert jnp.allclose(out, ref_f32, atol=1e-1, rtol=1e-1), \
        "mismatch vs f32 reference"

    # TODO(synk): BatchNorm1d running_mean/running_var buffer updates (training
    # side effect) are not modelled; only the forward output is produced.
    print("KERNEL_OK")
</pallas_src>

<mosaic_0001>
module attributes {stable_mosaic.version = 11 : i64} {
  func.func @_residual_mlp_kernel(%arg0: i32, %arg1: memref<64x128xbf16, #tpu.memory_space<vmem>>, %arg2: memref<128x128xbf16, #tpu.memory_space<vmem>>, %arg3: memref<1x128xf32, #tpu.memory_space<vmem>>, %arg4: memref<1x128xf32, #tpu.memory_space<vmem>>, %arg5: memref<1x128xf32, #tpu.memory_space<vmem>>, %arg6: memref<1x2x128x128xbf16, #tpu.memory_space<vmem>>, %arg7: memref<1x8x128xf32, #tpu.memory_space<vmem>>, %arg8: memref<128x128xbf16, #tpu.memory_space<vmem>>, %arg9: memref<1x128xf32, #tpu.memory_space<vmem>>, %arg10: memref<64x128xf32, #tpu.memory_space<vmem>>, %arg11: memref<64x128xf32, #tpu.memory_space<vmem>>) attributes {dimension_semantics = [#tpu.dimension_semantics<arbitrary>], iteration_bounds = array<i64: 3>, scalar_prefetch = 0 : i64, scratch_operands = 1 : i64, tpu.core_type = #tpu.core_type<tc>, window_params = [{pipeline_mode = #tpu.pipeline_mode<synchronous>, transform_indices = @transform_0, window_bounds = array<i64: 64, 128>}, {pipeline_mode = #tpu.pipeline_mode<synchronous>, transform_indices = @transform_1, window_bounds = array<i64: 128, 128>}, {pipeline_mode = #tpu.pipeline_mode<synchronous>, transform_indices = @transform_2, window_bounds = array<i64: 1, 128>}, {pipeline_mode = #tpu.pipeline_mode<synchronous>, transform_indices = @transform_3, window_bounds = array<i64: 1, 128>}, {pipeline_mode = #tpu.pipeline_mode<synchronous>, transform_indices = @transform_4, window_bounds = array<i64: 1, 128>}, {transform_indices = @transform_5, window_bounds = array<i64: 1, 2, 128, 128>}, {transform_indices = @transform_6, window_bounds = array<i64: 1, 8, 128>}, {pipeline_mode = #tpu.pipeline_mode<synchronous>, transform_indices = @transform_7, window_bounds = array<i64: 128, 128>}, {pipeline_mode = #tpu.pipeline_mode<synchronous>, transform_indices = @transform_8, window_bounds = array<i64: 1, 128>}, {pipeline_mode = #tpu.pipeline_mode<synchronous>, transform_indices = @transform_9, window_bounds = array<i64: 64, 128>}]} {
    %c0_i32 = arith.constant 0 : i32
    %0 = arith.cmpi eq, %arg0, %c0_i32 : i32
    %1 = arith.extui %0 : i1 to i32
    %c0_i32_0 = arith.constant 0 : i32
    %2 = arith.cmpi ne, %1, %c0_i32_0 : i32
    scf.if %2 {
      %c0_28 = arith.constant 0 : index
      %c0_29 = arith.constant 0 : index
      %71 = vector.load %arg1[%c0_28, %c0_29] : memref<64x128xbf16, #tpu.memory_space<vmem>>, vector<64x128xbf16>
      %c0_30 = arith.constant 0 : index
      %c0_31 = arith.constant 0 : index
      %72 = vector.load %arg2[%c0_30, %c0_31] : memref<128x128xbf16, #tpu.memory_space<vmem>>, vector<128x128xbf16>
      %cst_32 = arith.constant dense<0.000000e+00> : vector<64x128xf32>
      %73 = tpu.matmul %71, %72, %cst_32 {dimension_numbers = #tpu.dot_dimension_numbers<[1], [0], [0], [1], [0, 0, 1, 1], [], []>} : vector<64x128xbf16>, vector<128x128xbf16>, vector<64x128xf32> -> vector<64x128xf32>
      %c0_33 = arith.constant 0 : index
      %c0_34 = arith.constant 0 : index
      %74 = vector.load %arg3[%c0_33, %c0_34] : memref<1x128xf32, #tpu.memory_space<vmem>>, vector<1x128xf32>
      %75 = vector.broadcast %74 : vector<1x128xf32> to vector<64x128xf32>
      %76 = arith.addf %73, %75 : vector<64x128xf32>
      %cst_35 = arith.constant 0.000000e+00 : f32
      %77 = vector.broadcast %cst_35 : f32 to vector<64x128xf32>
      %78 = arith.maximumf %76, %77 : vector<64x128xf32>
      %c0_36 = arith.constant 0 : index
      %c0_37 = arith.constant 0 : index
      %79 = vector.load %arg4[%c0_36, %c0_37] : memref<1x128xf32, #tpu.memory_space<vmem>>, vector<1x128xf32>
      %c0_38 = arith.constant 0 : index
      %c0_39 = arith.constant 0 : index
      %80 = vector.load %arg5[%c0_38, %c0_39] : memref<1x128xf32, #tpu.memory_space<vmem>>, vector<1x128xf32>
      %cst_40 = arith.constant dense<0.000000e+00> : vector<128xf32>
      %81 = vector.multi_reduction <add>, %78, %cst_40 [0] : vector<64x128xf32> to vector<128xf32>
      %82 = vector.shape_cast %81 : vector<128xf32> to vector<1x128xf32>
      %cst_41 = arith.constant 6.400000e+01 : f32
      %83 = vector.broadcast %cst_41 : f32 to vector<1x128xf32>
      %84 = arith.divf %82, %83 : vector<1x128xf32>
      %85 = vector.broadcast %84 : vector<1x128xf32> to vector<64x128xf32>
      %86 = arith.subf %78, %85 : vector<64x128xf32>
      %87 = arith.mulf %86, %86 : vector<64x128xf32>
      %cst_42 = arith.constant dense<0.000000e+00> : vector<128xf32>
      %88 = vector.multi_reduction <add>, %87, %cst_42 [0] : vector<64x128xf32> to vector<128xf32>
      %89 = vector.shape_cast %88 : vector<128xf32> to vector<1x128xf32>
      %cst_43 = arith.constant 6.400000e+01 : f32
      %90 = vector.broadcast %cst_43 : f32 to vector<1x128xf32>
      %91 = arith.divf %89, %90 : vector<1x128xf32>
      %cst_44 = arith.constant 9.99999974E-6 : f32
      %92 = vector.broadcast %cst_44 : f32 to vector<1x128xf32>
      %93 = arith.addf %91, %92 : vector<1x128xf32>
      %94 = math.rsqrt %93 : vector<1x128xf32>
      %95 = arith.mulf %94, %79 : vector<1x128xf32>
      %96 = vector.broadcast %95 : vector<1x128xf32> to vector<64x128xf32>
      %97 = arith.mulf %86, %96 : vector<64x128xf32>
      %98 = vector.broadcast %80 : vector<1x128xf32> to vector<64x128xf32>
      %99 = arith.addf %97, %98 : vector<64x128xf32>
      %c0_45 = arith.constant 0 : index
      %c0_46 = arith.constant 0 : index
      %100 = vector.load %arg11[%c0_45, %c0_46] : memref<64x128xf32, #tpu.memory_space<vmem>>, vector<64x128xf32>
      tpu.vector_store %arg11[%c0_45, %c0_46], %99 {strides = array<i32>} : memref<64x128xf32, #tpu.memory_space<vmem>>, vector<64x128xf32>,
    } else {
    }
    %c0 = arith.constant 0 : index
    %c0_1 = arith.constant 0 : index
    %c0_2 = arith.constant 0 : index
    %3 = vector.load %arg7[%c0, %c0_1, %c0_2] : memref<1x8x128xf32, #tpu.memory_space<vmem>>, vector<1x8x128xf32>
    %4 = vector.shape_cast %3 : vector<1x8x128xf32> to vector<8x128xf32>
    %5 = vector.extract_strided_slice %4 {offsets = [0, 0], sizes = [1, 128], strides = [1, 1]} : vector<8x128xf32> to vector<1x128xf32>
    %6 = vector.extract_strided_slice %4 {offsets = [1, 0], sizes = [1, 128], strides = [1, 1]} : vector<8x128xf32> to vector<1x128xf32>
    %7 = vector.extract_strided_slice %4 {offsets = [2, 0], sizes = [1, 128], strides = [1, 1]} : vector<8x128xf32> to vector<1x128xf32>
    %8 = vector.extract_strided_slice %4 {offsets = [3, 0], sizes = [1, 128], strides = [1, 1]} : vector<8x128xf32> to vector<1x128xf32>
    %9 = vector.extract_strided_slice %4 {offsets = [4, 0], sizes = [1, 128], strides = [1, 1]} : vector<8x128xf32> to vector<1x128xf32>
    %10 = vector.extract_strided_slice %4 {offsets = [5, 0], sizes = [1, 128], strides = [1, 1]} : vector<8x128xf32> to vector<1x128xf32>
    %c0_3 = arith.constant 0 : index
    %c0_4 = arith.constant 0 : index
    %11 = vector.load %arg11[%c0_3, %c0_4] : memref<64x128xf32, #tpu.memory_space<vmem>>, vector<64x128xf32>
    %12 = arith.truncf %11 : vector<64x128xf32> to vector<64x128xbf16>
    %c0_5 = arith.constant 0 : index
    %c0_6 = arith.constant 0 : index
    %c0_7 = arith.constant 0 : index
    %c0_8 = arith.constant 0 : index
    %13 = vector.load %arg6[%c0_5, %c0_6, %c0_7, %c0_8] : memref<1x2x128x128xbf16, #tpu.memory_space<vmem>>, vector<1x1x128x128xbf16>
    %14 = vector.shape_cast %13 : vector<1x1x128x128xbf16> to vector<128x128xbf16>
    %cst = arith.constant dense<0.000000e+00> : vector<64x128xf32>
    %15 = tpu.matmul %12, %14, %cst {dimension_numbers = #tpu.dot_dimension_numbers<[1], [0], [0], [1], [0, 0, 1, 1], [], []>} : vector<64x128xbf16>, vector<128x128xbf16>, vector<64x128xf32> -> vector<64x128xf32>
    %16 = vector.broadcast %5 : vector<1x128xf32> to vector<64x128xf32>
    %17 = arith.addf %15, %16 : vector<64x128xf32>
    %cst_9 = arith.constant 0.000000e+00 : f32
    %18 = vector.broadcast %cst_9 : f32 to vector<64x128xf32>
    %19 = arith.maximumf %17, %18 : vector<64x128xf32>
    %cst_10 = arith.constant dense<0.000000e+00> : vector<128xf32>
    %20 = vector.multi_reduction <add>, %19, %cst_10 [0] : vector<64x128xf32> to vector<128xf32>
    %21 = vector.shape_cast %20 : vector<128xf32> to vector<1x128xf32>
    %cst_11 = arith.constant 6.400000e+01 : f32
    %22 = vector.broadcast %cst_11 : f32 to vector<1x128xf32>
    %23 = arith.divf %21, %22 : vector<1x128xf32>
    %24 = vector.broadcast %23 : vector<1x128xf32> to vector<64x128xf32>
    %25 = arith.subf %19, %24 : vector<64x128xf32>
    %26 = arith.mulf %25, %25 : vector<64x128xf32>
    %cst_12 = arith.constant dense<0.000000e+00> : vector<128xf32>
    %27 = vector.multi_reduction <add>, %26, %cst_12 [0] : vector<64x128xf32> to vector<128xf32>
    %28 = vector.shape_cast %27 : vector<128xf32> to vector<1x128xf32>
    %cst_13 = arith.constant 6.400000e+01 : f32
    %29 = vector.broadcast %cst_13 : f32 to vector<1x128xf32>
    %30 = arith.divf %28, %29 : vector<1x128xf32>
    %cst_14 = arith.constant 9.99999974E-6 : f32
    %31 = vector.broadcast %cst_14 : f32 to vector<1x128xf32>
    %32 = arith.addf %30, %31 : vector<1x128xf32>
    %33 = math.rsqrt %32 : vector<1x128xf32>
    %34 = arith.mulf %33, %6 : vector<1x128xf32>
    %35 = vector.broadcast %34 : vector<1x128xf32> to vector<64x128xf32>
    %36 = arith.mulf %25, %35 : vector<64x128xf32>
    %37 = vector.broadcast %7 : vector<1x128xf32> to vector<64x128xf32>
    %38 = arith.addf %36, %37 : vector<64x128xf32>
    %39 = arith.truncf %38 : vector<64x128xf32> to vector<64x128xbf16>
    %c0_15 = arith.constant 0 : index
    %c1 = arith.constant 1 : index
    %c0_16 = arith.constant 0 : index
    %c0_17 = arith.constant 0 : index
    %40 = vector.load %arg6[%c0_15, %c1, %c0_16, %c0_17] : memref<1x2x128x128xbf16, #tpu.memory_space<vmem>>, vector<1x1x128x128xbf16>
    %41 = vector.shape_cast %40 : vector<1x1x128x128xbf16> to vector<128x128xbf16>
    %cst_18 = arith.constant dense<0.000000e+00> : vector<64x128xf32>
    %42 = tpu.matmul %39, %41, %cst_18 {dimension_numbers = #tpu.dot_dimension_numbers<[1], [0], [0], [1], [0, 0, 1, 1], [], []>} : vector<64x128xbf16>, vector<128x128xbf16>, vector<64x128xf32> -> vector<64x128xf32>
    %43 = vector.broadcast %8 : vector<1x128xf32> to vector<64x128xf32>
    %44 = arith.addf %42, %43 : vector<64x128xf32>
    %cst_19 = arith.constant 0.000000e+00 : f32
    %45 = vector.broadcast %cst_19 : f32 to vector<64x128xf32>
    %46 = arith.maximumf %44, %45 : vector<64x128xf32>
    %cst_20 = arith.constant dense<0.000000e+00> : vector<128xf32>
    %47 = vector.multi_reduction <add>, %46, %cst_20 [0] : vector<64x128xf32> to vector<128xf32>
    %48 = vector.shape_cast %47 : vector<128xf32> to vector<1x128xf32>
    %cst_21 = arith.constant 6.400000e+01 : f32
    %49 = vector.broadcast %cst_21 : f32 to vector<1x128xf32>
    %50 = arith.divf %48, %49 : vector<1x128xf32>
    %51 = vector.broadcast %50 : vector<1x128xf32> to vector<64x128xf32>
    %52 = arith.subf %46, %51 : vector<64x128xf32>
    %53 = arith.mulf %52, %52 : vector<64x128xf32>
    %cst_22 = arith.constant dense<0.000000e+00> : vector<128xf32>
    %54 = vector.multi_reduction <add>, %53, %cst_22 [0] : vector<64x128xf32> to vector<128xf32>
    %55 = vector.shape_cast %54 : vector<128xf32> to vector<1x128xf32>
    %cst_23 = arith.constant 6.400000e+01 : f32
    %56 = vector.broadcast %cst_23 : f32 to vector<1x128xf32>
    %57 = arith.divf %55, %56 : vector<1x128xf32>
    %cst_24 = arith.constant 9.99999974E-6 : f32
    %58 = vector.broadcast %cst_24 : f32 to vector<1x128xf32>
    %59 = arith.addf %57, %58 : vector<1x128xf32>
    %60 = math.rsqrt %59 : vector<1x128xf32>
    %61 = arith.mulf %60, %9 : vector<1x128xf32>
    %62 = vector.broadcast %61 : vector<1x128xf32> to vector<64x128xf32>
    %63 = arith.mulf %52, %62 : vector<64x128xf32>
    %64 = vector.broadcast %10 : vector<1x128xf32> to vector<64x128xf32>
    %65 = arith.addf %63, %64 : vector<64x128xf32>
    %66 = arith.addf %11, %65 : vector<64x128xf32>
    %c0_25 = arith.constant 0 : index
    %c0_26 = arith.constant 0 : index
    %67 = vector.load %arg11[%c0_25, %c0_26] : memref<64x128xf32, #tpu.memory_space<vmem>>, vector<64x128xf32>
    tpu.vector_store %arg11[%c0_25, %c0_26], %66 {strides = array<i32>} : memref<64x128xf32, #tpu.memory_space<vmem>>, vector<64x128xf32>,
    %c2_i32 = arith.constant 2 : i32
    %68 = arith.cmpi eq, %arg0, %c2_i32 : i32
    %69 = arith.extui %68 : i1 to i32
    %c0_i32_27 = arith.constant 0 : i32
    %70 = arith.cmpi ne, %69, %c0_i32_27 : i32
    scf.if %70 {
      %c0_28 = arith.constant 0 : index
      %c0_29 = arith.constant 0 : index
      %71 = vector.load %arg11[%c0_28, %c0_29] : memref<64x128xf32, #tpu.memory_space<vmem>>, vector<64x128xf32>
      %72 = arith.truncf %71 : vector<64x128xf32> to vector<64x128xbf16>
      %c0_30 = arith.constant 0 : index
      %c0_31 = arith.constant 0 : index
      %73 = vector.load %arg8[%c0_30, %c0_31] : memref<128x128xbf16, #tpu.memory_space<vmem>>, vector<128x128xbf16>
      %cst_32 = arith.constant dense<0.000000e+00> : vector<64x128xf32>
      %74 = tpu.matmul %72, %73, %cst_32 {dimension_numbers = #tpu.dot_dimension_numbers<[1], [0], [0], [1], [0, 0, 1, 1], [], []>} : vector<64x128xbf16>, vector<128x128xbf16>, vector<64x128xf32> -> vector<64x128xf32>
      %c0_33 = arith.constant 0 : index
      %c0_34 = arith.constant 0 : index
      %75 = vector.load %arg9[%c0_33, %c0_34] : memref<1x128xf32, #tpu.memory_space<vmem>>, vector<1x128xf32>
      %76 = vector.broadcast %75 : vector<1x128xf32> to vector<64x128xf32>
      %77 = arith.addf %74, %76 : vector<64x128xf32>
      %c0_35 = arith.constant 0 : index
      %c0_36 = arith.constant 0 : index
      %78 = vector.load %arg10[%c0_35, %c0_36] : memref<64x128xf32, #tpu.memory_space<vmem>>, vector<64x128xf32>
      tpu.vector_store %arg10[%c0_35, %c0_36], %77 {strides = array<i32>} : memref<64x128xf32, #tpu.memory_space<vmem>>, vector<64x128xf32>,
    } else {
    }
    return
  }
  func.func @transform_0(%arg0: i32) -> (i32, i32) {
    %c0_i32 = arith.constant 0 : i32
    %c0_i32_0 = arith.constant 0 : i32
    %c0_i32_1 = arith.constant 0 : i32
    return %c0_i32, %c0_i32_0 : i32, i32
  }
  func.func @transform_1(%arg0: i32) -> (i32, i32) {
    %c0_i32 = arith.constant 0 : i32
    %c0_i32_0 = arith.constant 0 : i32
    %c0_i32_1 = arith.constant 0 : i32
    return %c0_i32, %c0_i32_0 : i32, i32
  }
  func.func @transform_2(%arg0: i32) -> (i32, i32) {
    %c0_i32 = arith.constant 0 : i32
    %c0_i32_0 = arith.constant 0 : i32
    %c0_i32_1 = arith.constant 0 : i32
    return %c0_i32, %c0_i32_0 : i32, i32
  }
  func.func @transform_3(%arg0: i32) -> (i32, i32) {
    %c0_i32 = arith.constant 0 : i32
    %c0_i32_0 = arith.constant 0 : i32
    %c0_i32_1 = arith.constant 0 : i32
    return %c0_i32, %c0_i32_0 : i32, i32
  }
  func.func @transform_4(%arg0: i32) -> (i32, i32) {
    %c0_i32 = arith.constant 0 : i32
    %c0_i32_0 = arith.constant 0 : i32
    %c0_i32_1 = arith.constant 0 : i32
    return %c0_i32, %c0_i32_0 : i32, i32
  }
  func.func @transform_5(%arg0: i32) -> (i32, i32, i32, i32) {
    %c0_i32 = arith.constant 0 : i32
    %c0_i32_0 = arith.constant 0 : i32
    %c0_i32_1 = arith.constant 0 : i32
    %c0_i32_2 = arith.constant 0 : i32
    return %arg0, %c0_i32, %c0_i32_0, %c0_i32_1 : i32, i32, i32, i32
  }
  func.func @transform_6(%arg0: i32) -> (i32, i32, i32) {
    %c0_i32 = arith.constant 0 : i32
    %c0_i32_0 = arith.constant 0 : i32
    %c0_i32_1 = arith.constant 0 : i32
    return %arg0, %c0_i32, %c0_i32_0 : i32, i32, i32
  }
  func.func @transform_7(%arg0: i32) -> (i32, i32) {
    %c0_i32 = arith.constant 0 : i32
    %c0_i32_0 = arith.constant 0 : i32
    %c0_i32_1 = arith.constant 0 : i32
    return %c0_i32, %c0_i32_0 : i32, i32
  }
  func.func @transform_8(%arg0: i32) -> (i32, i32) {
    %c0_i32 = arith.constant 0 : i32
    %c0_i32_0 = arith.constant 0 : i32
    %c0_i32_1 = arith.constant 0 : i32
    return %c0_i32, %c0_i32_0 : i32, i32
  }
  func.func @transform_9(%arg0: i32) -> (i32, i32) {
    %c0_i32 = arith.constant 0 : i32
    %c0_i32_0 = arith.constant 0 : i32
    %c0_i32_1 = arith.constant 0 : i32
    return %c0_i32, %c0_i32_0 : i32, i32
  }
}

</mosaic_0001>

<bundles_post_ra>
// kernel: residual_mlp.1
= control target key start
LH: loop header
LB: loop body
LE: loop exit
PB: predicated region body
PF: predicated region fallthrough
CT: control target
= control target key end

     0   :  { %s1478_s30 = smov 0   ;;  %s1689_s0 = inlined_call_operand.vmem [shape: bf16[64,128], index: 0, kind: input, shape index: {}]   ;;  %s1690_s1 = inlined_call_operand.vmem [shape: bf16[128,128], index: 1, kind: input, shape index: {}]   ;;  %s1691_s2 = inlined_call_operand.vmem [shape: f32[1,128], index: 2, kind: input, shape index: {}]   ;;  %s1692_s3 = inlined_call_operand.vmem [shape: f32[1,128], index: 3, kind: input, shape index: {}]   ;;  %s1693_s4 = inlined_call_operand.vmem [shape: f32[1,128], index: 4, kind: input, shape index: {}]   ;;  %s1694_s5 = inlined_call_operand.vmem [shape: bf16[3,2,128,128], index: 5, kind: input, shape index: {}]   ;;  %s1695_s6 = inlined_call_operand.vmem [shape: f32[3,8,128], index: 6, kind: input, shape index: {}]   ;;  %s1696_s7 = inlined_call_operand.vmem [shape: bf16[128,128], index: 7, kind: input, shape index: {}]   ;;  %s1697_s8 = inlined_call_operand.vmem [shape: f32[1,128], index: 8, kind: input, shape index: {}]   ;;  %s1698_s9 = inlined_call_operand.vmem [shape: f32[64,128], index: 9, kind: output, shape index: {}]  }
   0x1 LB: > { %s1484_s10 = sadd.s32 4294967295, %s1424_s30   ;;  %p1126_p0 = scmp.ge.s32.totalorder %s1424_s30, 1  ;;  %s1424_s30 = sphi %s1478_s30, %s19_s30  }
   0x2   : > { %p291_p1 = scmp.lt.s32.totalorder %s1424_s30, 4 }
   0x4   : > { %p292_p2 = pnand %p1126_p0, %p291_p1 }
   0x5   : > { %p326_p3 = scmp.lt.s32.totalorder (!%p292_p2), %s1484_s10, 2  ;;  %p1130_p4 = scmp.ne.s32.totalorder (!%p292_p2), %s1484_s10, 0 }
   0x6   : > { %295 = sbr.rel (%p292_p2) target bundleno = 980 (0x3d4), region = 56 }
   0xb   : > { %s327_s11 = scalar_select %p326_p3, %s1484_s10, 2 }
   0xc   : > { %338 = sbr.rel (%p1130_p4) target bundleno = 283 (0x11b), region = 60 }
   0xd   : > { %s1294_s12 = sshll.u32 %s327_s11, 7  ;;  %s1129_s13 = sshll.u32 %s327_s11, 3 }
   0xe   : > { %s1493_s16 = scalar_lea.vmem %s1694_s5, %s1294_s12  ;;  %s1498_s19 = scalar_lea.vmem %s1695_s6, %s1129_s13 }
  0x11   : > { %v1306_v0 = vld [vmem:[%s1690_s1 + $0x38] sm:$0xff]  ;;  %v1305_v1 = vld [vmem:[%s1690_s1 + $0x30] sm:$0xff]  ;;  %v1304_v2 = vld [vmem:[%s1690_s1 + $0x28] sm:$0xff]  ;;  %v1426_v25 = vmov 64.0  }
  0x12   : > { %439 = vmatpush.bf16.msra.mxu0 %v1306_v0  ;;  %1331 = vmatpush.bf16.msra.mxu1 %v1306_v0  ;;  %v1303_v3 = vld [vmem:[%s1690_s1 + $0x20] sm:$0xff]  ;;  %v1302_v4 = vld [vmem:[%s1690_s1 + $0x18] sm:$0xff]  ;;  %v1301_v5 = vld [vmem:[%s1690_s1 + $0x10] sm:$0xff]  ;;  %1407 = vrcp.f32 %v1426_v25 }
  0x13   : > { %1332 = vmatpush.bf16.msra.mxu2 %v1306_v0  ;;  %1333 = vmatpush.bf16.msra.mxu3 %v1306_v0  ;;  %v1300_v6 = vld [vmem:[%s1690_s1 + $0x8] sm:$0xff]  ;;  %v1299_v7 = vld [vmem:[%s1690_s1] sm:$0xff]  ;;  %v1297_v10 = vld [vmem:[%s1689_s0 + $0x10] sm:$0xff] }
  0x14   : > { %v1295_v8 = vld [vmem:[%s1689_s0] sm:$0xff]  ;;  %v1296_v9 = vld [vmem:[%s1689_s0 + $0x8] sm:$0xff]  ;;  %v1298_v11 = vld [vmem:[%s1689_s0 + $0x18] sm:$0xff] }
  0x15   : > { %v1405_v14 = vld [vmem:[%s1691_s2] ss:$0 sm:$0xff] }
  0x16   : > { %440 = vmatpush.bf16.msra.mxu0 %v1305_v1  ;;  %1334 = vmatpush.bf16.msra.mxu1 %v1305_v1 }
  0x17   : > { %1335 = vmatpush.bf16.msra.mxu2 %v1305_v1  ;;  %1336 = vmatpush.bf16.msra.mxu3 %v1305_v1 }
  0x18   : > { %v1408_v34 = vpop.eup %1407 }
  0x19   : > { %v492_v41 = vmul.f32 64.0, %v1408_v34  ;;  %vm496_vm0 = vweird.f32 %v1408_v34 }
  0x1a   : > { %441 = vmatpush.bf16.msra.mxu0 %v1304_v2  ;;  %1337 = vmatpush.bf16.msra.mxu1 %v1304_v2 }
  0x1b   : > { %1338 = vmatpush.bf16.msra.mxu2 %v1304_v2  ;;  %1339 = vmatpush.bf16.msra.mxu3 %v1304_v2  ;;  %v493_v46 = vsub.f32 1.0, %v492_v41 }
  0x1d   : > { %v494_v49 = vmul.f32 %v1408_v34, %v493_v46 }
  0x1e   : > { %442 = vmatpush.bf16.msra.mxu0 %v1303_v3  ;;  %1340 = vmatpush.bf16.msra.mxu1 %v1303_v3 }
  0x1f   : > { %1341 = vmatpush.bf16.msra.mxu2 %v1303_v3  ;;  %1342 = vmatpush.bf16.msra.mxu3 %v1303_v3  ;;  %v495_v52 = vadd.f32 %v1408_v34, %v494_v49 }
  0x21   : > { %v497_v55 = vsel %vm496_vm0, %v1408_v34, %v495_v52 }
  0x22   : > { %443 = vmatpush.bf16.msra.mxu0 %v1302_v4  ;;  %1343 = vmatpush.bf16.msra.mxu1 %v1302_v4 }
  0x23   : > { %1344 = vmatpush.bf16.msra.mxu2 %v1302_v4  ;;  %1345 = vmatpush.bf16.msra.mxu3 %v1302_v4 }
  0x26   : > { %444 = vmatpush.bf16.msra.mxu0 %v1301_v5  ;;  %1346 = vmatpush.bf16.msra.mxu1 %v1301_v5 }
  0x27   : > { %1347 = vmatpush.bf16.msra.mxu2 %v1301_v5  ;;  %1348 = vmatpush.bf16.msra.mxu3 %v1301_v5 }
  0x2a   : > { %445 = vmatpush.bf16.msra.mxu0 %v1300_v6  ;;  %1349 = vmatpush.bf16.msra.mxu1 %v1300_v6 }
  0x2b   : > { %1350 = vmatpush.bf16.msra.mxu2 %v1300_v6  ;;  %1351 = vmatpush.bf16.msra.mxu3 %v1300_v6 }
  0x2e   : > { %446 = vmatpush.bf16.msra.mxu0 %v1299_v7  ;;  %1352 = vmatpush.bf16.msra.mxu1 %v1299_v7 }
  0x2f   : > { %1353 = vmatpush.bf16.msra.mxu2 %v1299_v7  ;;  %1354 = vmatpush.bf16.msra.mxu3 %v1299_v7 }
  0x31   : > { %447 = vmatmul.bf16.vlgmr.msra.gmra.mxu0 %v1295_v8  ;;  %452 = vmatmul.bf16.vlgmr.msra.gmra.mxu1 %v1296_v9 }
  0x32   : > { %457 = vmatmul.bf16.vlgmr.msra.gmra.mxu2 %v1297_v10  ;;  %462 = vmatmul.bf16.vlgmr.msra.gmra.mxu3 %v1298_v11 }
  0xae   : > { %v448_v12 = vpop.f32.mrf.mxu0  ;;  %v453_v13 = vpop.f32.mrf.mxu1 }
  0xaf   : > { %v449_v15 = vadd.f32 %v1405_v14, %v448_v12  ;;  %v454_v20 = vadd.f32 %v1405_v14, %v453_v13 }
  0xb1   : > { %v468_v22 = vmax.f32 %v449_v15, 0.0  ;;  %v470_v26 = vmax.f32 %v454_v20, 0.0 }
  0xb5   : > { %v458_v16 = vpop.f32.mrf.mxu2  ;;  %v463_v17 = vpop.f32.mrf.mxu3 }
  0xb6   : > { %v450_v18 = vpop.f32.mrf.mxu0  ;;  %v455_v19 = vpop.f32.mrf.mxu1  ;;  %v459_v27 = vadd.f32 %v1405_v14, %v458_v16  ;;  %v464_v36 = vadd.f32 %v1405_v14, %v463_v17 }
  0xb7   : > { %v451_v21 = vadd.f32 %v1405_v14, %v450_v18  ;;  %v456_v24 = vadd.f32 %v1405_v14, %v455_v19 }
  0xb8   : > { %v472_v35 = vmax.f32 %v459_v27, 0.0  ;;  %v474_v42 = vmax.f32 %v464_v36, 0.0 }
  0xb9   : > { %v469_v23 = vmax.f32 %v451_v21, 0.0  ;;  %v471_v29 = vmax.f32 %v456_v24, 0.0 }
  0xbb   : > { %v478_v28 = vadd.f32 %v469_v23, %v468_v22 }
  0xbd   : > { %v479_v30 = vadd.f32 %v478_v28, %v470_v26  ;;  %v460_v31 = vpop.f32.mrf.mxu2  ;;  %v465_v33 = vpop.f32.mrf.mxu3 }
  0xbe   : > { %v461_v32 = vadd.f32 %v1405_v14, %v460_v31  ;;  %v466_v40 = vadd.f32 %v1405_v14, %v465_v33 }
  0xbf   : > { %v480_v37 = vadd.f32 %v479_v30, %v471_v29  ;;  %v476_v30 = vld [vmem:[%s1692_s3] sm:$0x1] }
  0xc0   : > { %v473_v38 = vmax.f32 %v461_v32, 0.0  ;;  %v475_v44 = vmax.f32 %v466_v40, 0.0 }
  0xc1   : > { %v481_v39 = vadd.f32 %v480_v37, %v472_v35 }
  0xc3   : > { %v482_v43 = vadd.f32 %v481_v39, %v473_v38 }
  0xc5   : > { %v483_v45 = vadd.f32 %v482_v43, %v474_v42 }
  0xc7   : > { %v484_v47 = vadd.f32 %v483_v45, %v475_v44 }
  0xc9   : > { %v485_v48 = vrot.slane %v484_v47, 4 }
  0xcb   : > { %v486_v50 = vadd.f32 %v485_v48, %v484_v47 }
  0xcd   : > { %v487_v51 = vrot.slane %v486_v50, 2 }
  0xcf   : > { %v488_v53 = vadd.f32 %v487_v51, %v486_v50 }
  0xd1   : > { %v489_v54 = vrot.slane %v488_v53, 1 }
  0xd3   : > { %v490_v56 = vadd.f32 %v489_v54, %v488_v53 }
  0xd5   : > { %v498_v57 = vmul.f32 %v497_v55, %v490_v56 }
  0xd7   : > { %v499_v58 = vsub.f32 %v468_v22, %v498_v57  ;;  %v500_v59 = vsub.f32 %v469_v23, %v498_v57  ;;  %v501_v60 = vsub.f32 %v470_v26, %v498_v57  ;;  %v502_v61 = vsub.f32 %v471_v29, %v498_v57 }
  0xd8   : > { %v503_v0 = vsub.f32 %v472_v35, %v498_v57  ;;  %v504_v3 = vsub.f32 %v473_v38, %v498_v57  ;;  %v505_v6 = vsub.f32 %v474_v42, %v498_v57  ;;  %v506_v9 = vsub.f32 %v475_v44, %v498_v57  ;;  %v1406_v35 = vld [vmem:[%s1693_s4] ss:$0 sm:$0xff] }
  0xd9   : > { %v507_v62 = vmul.f32 %v499_v58, %v499_v58  ;;  %v508_v63 = vmul.f32 %v500_v59, %v500_v59  ;;  %v509_v1 = vmul.f32 %v501_v60, %v501_v60  ;;  %v510_v4 = vmul.f32 %v502_v61, %v502_v61 }
  0xda   : > { %v511_v7 = vmul.f32 %v503_v0, %v503_v0  ;;  %v512_v10 = vmul.f32 %v504_v3, %v504_v3  ;;  %v513_v12 = vmul.f32 %v505_v6, %v505_v6  ;;  %v514_v14 = vmul.f32 %v506_v9, %v506_v9 }
  0xdb   : > { %v515_v2 = vadd.f32 %v508_v63, %v507_v62 }
  0xdd   : > { %v516_v5 = vadd.f32 %v515_v2, %v509_v1 }
  0xdf   : > { %v517_v8 = vadd.f32 %v516_v5, %v510_v4 }
  0xe1   : > { %v518_v11 = vadd.f32 %v517_v8, %v511_v7 }
  0xe3   : > { %v519_v13 = vadd.f32 %v518_v11, %v512_v10 }
  0xe5   : > { %v520_v15 = vadd.f32 %v519_v13, %v513_v12 }
  0xe7   : > { %v521_v16 = vadd.f32 %v520_v15, %v514_v14 }
  0xe9   : > { %v522_v17 = vrot.slane %v521_v16, 4 }
  0xeb   : > { %v523_v18 = vadd.f32 %v522_v17, %v521_v16 }
  0xed   : > { %v524_v19 = vrot.slane %v523_v18, 2 }
  0xef   : > { %v525_v20 = vadd.f32 %v524_v19, %v523_v18 }
  0xf1   : > { %v526_v21 = vrot.slane %v525_v20, 1 }
  0xf3   : > { %v527_v22 = vadd.f32 %v526_v21, %v525_v20 }
  0xf5   : > { %v528_v23 = vmul.f32 %v527_v22, %v497_v55 }
  0xf7   : > { %v529_v24 = vadd.f32 1e-05, %v528_v23 }
  0xf9   : > { %1409 = vrsqrt.f32 %v529_v24  ;;  %vm536_vm2 = vweird.f32 %v529_v24 }
  0xff   : > { %v1410_v25 = vpop.eup %1409 }
 0x100   : > { %v531_v26 = vmul.f32 %v1410_v25, %v529_v24  ;;  %vm537_vm1 = vweird.f32 %v1410_v25 }
 0x101   : > { %vm538_vm3 = vmor %vm536_vm2, %vm537_vm1 }
 0x102   : > { %v532_v27 = vmul.f32 %v1410_v25, %v531_v26 }
 0x104   : > { %v533_v28 = vmul.f32 0.5, %v532_v27 }
 0x106   : > { %v534_v29 = vsub.f32 1.5, %v533_v28 }
 0x108   : > { %v535_v31 = vmul.f32 %v1410_v25, %v534_v29 }
 0x10a   : > { %v539_v32 = vsel %vm538_vm3, %v1410_v25, %v535_v31 }
 0x10b   : > { %v540_v33 = vmul.f32 %v539_v32, %v476_v30 }
 0x10d   : > { %v541_v34 = vperm.slane %v540_v33, 0 }
 0x10f   : > { %v542_v36 = vmul.f32 %v541_v34, %v499_v58  ;;  %v543_v37 = vmul.f32 %v541_v34, %v500_v59  ;;  %v544_v38 = vmul.f32 %v541_v34, %v501_v60  ;;  %v545_v39 = vmul.f32 %v541_v34, %v502_v61 }
 0x110   : > { %v546_v40 = vmul.f32 %v541_v34, %v503_v0  ;;  %v547_v41 = vmul.f32 %v541_v34, %v504_v3  ;;  %v548_v42 = vmul.f32 %v541_v34, %v505_v6  ;;  %v549_v46 = vmul.f32 %v541_v34, %v506_v9 }
 0x111   : > { %v553_v43 = vadd.f32 %v1406_v35, %v542_v36  ;;  %v554_v44 = vadd.f32 %v1406_v35, %v543_v37  ;;  %v555_v45 = vadd.f32 %v1406_v35, %v544_v38  ;;  %v556_v47 = vadd.f32 %v1406_v35, %v545_v39 }
 0x112   : > { %v557_v48 = vadd.f32 %v1406_v35, %v546_v40  ;;  %v558_v49 = vadd.f32 %v1406_v35, %v547_v41  ;;  %v559_v50 = vadd.f32 %v1406_v35, %v548_v42  ;;  %v560_v51 = vadd.f32 %v1406_v35, %v549_v46 }
 0x113   : > { %561 = vst [vmem:[#allocation2 + $0x30] sm:$0xff] %v553_v43 }
 0x114   : > { %562 = vst [vmem:[#allocation2] sm:$0xff] %v554_v44 }
 0x115   : > { %563 = vst [vmem:[#allocation2 + $0x18] sm:$0xff] %v555_v45 }
 0x116   : > { %564 = vst [vmem:[#allocation2 + $0x10] sm:$0xff] %v556_v47 }
 0x117   : > { %565 = vst [vmem:[#allocation2 + $0x8] sm:$0xff] %v557_v48 }
 0x118   : > { %566 = vst [vmem:[#allocation2 + $0x20] sm:$0xff] %v558_v49 }
 0x119   : > { %567 = vst [vmem:[#allocation2 + $0x28] sm:$0xff] %v559_v50 }
 0x11a   : > { %568 = vst [vmem:[#allocation2 + $0x38] sm:$0xff] %v560_v51 }
 0x11b PF: > { %v1314_v52 = vld [vmem:[%s1493_s16 + $0x38] sm:$0xff]  ;;  %v1313_v53 = vld [vmem:[%s1493_s16 + $0x30] sm:$0xff]  ;;  %v1312_v54 = vld [vmem:[%s1493_s16 + $0x28] sm:$0xff]  ;;  %v1427_v22 = vmov 64.0   ;;  %p1259_p5 = scmp.ne.s32.totalorder %s1484_s10, 2 }
 0x11c   : > { %647 = vmatpush.bf16.msra.mxu0 %v1314_v52  ;;  %1355 = vmatpush.bf16.msra.mxu2 %v1314_v52  ;;  %v1311_v55 = vld [vmem:[%s1493_s16 + $0x20] sm:$0xff]  ;;  %v1310_v56 = vld [vmem:[%s1493_s16 + $0x18] sm:$0xff]  ;;  %v1309_v57 = vld [vmem:[%s1493_s16 + $0x10] sm:$0xff]  ;;  %1411 = vrcp.f32 %v1427_v22 }
 0x11d   : > { %v1308_v58 = vld [vmem:[%s1493_s16 + $0x8] sm:$0xff]  ;;  %v1307_v59 = vld [vmem:[%s1493_s16] sm:$0xff]  ;;  %v1554_v60 = vld [vmem:[#allocation2 + $0x30] sm:$0xff] }
 0x11e   : > { %v1556_v61 = vld [vmem:[#allocation2] sm:$0xff]  ;;  %v1558_v62 = vld [vmem:[#allocation2 + $0x8] sm:$0xff]  ;;  %v1566_v2 = vld [vmem:[#allocation2 + $0x18] sm:$0xff] }
 0x11f   : > { %v1560_v63 = vld [vmem:[#allocation2 + $0x20] sm:$0xff]  ;;  %v578_v0 = vpack.c.bf16 %v1556_v61, %v1554_v60  ;;  %v1568_v3 = vld [vmem:[#allocation2 + $0x10] sm:$0xff] }
 0x120   : > { %648 = vmatpush.bf16.msra.mxu0 %v1313_v53  ;;  %1356 = vmatpush.bf16.msra.mxu2 %v1313_v53  ;;  %v580_v1 = vpack.c.bf16 %v1560_v63, %v1558_v62  ;;  %v1570_v4 = vld [vmem:[#allocation2 + $0x28] sm:$0xff]  ;;  %v579_v6 = vpack.c.bf16 %v1568_v3, %v1566_v2  ;;  %v1579_v11 = vld [vmem:[%s1498_s19] sm:$0xff] }
 0x121   : > { %v1572_v5 = vld [vmem:[#allocation2 + $0x38] sm:$0xff]  ;;  %v598_v13 = vperm.slane %v1579_v11, 0 }
 0x122   : > { %v581_v7 = vpack.c.bf16 %v1572_v5, %v1570_v4  ;;  %v1412_v30 = vpop.eup %1411 }
 0x123   : > { %v698_v38 = vmul.f32 64.0, %v1412_v30  ;;  %vm702_vm4 = vweird.f32 %v1412_v30 }
 0x124   : > { %649 = vmatpush.bf16.msra.mxu0 %v1312_v54  ;;  %1357 = vmatpush.bf16.msra.mxu2 %v1312_v54 }
 0x125   : > { %v699_v43 = vsub.f32 1.0, %v698_v38 }
 0x127   : > { %v700_v46 = vmul.f32 %v1412_v30, %v699_v43 }
 0x128   : > { %650 = vmatpush.bf16.msra.mxu0 %v1311_v55  ;;  %1358 = vmatpush.bf16.msra.mxu2 %v1311_v55  ;;  %v1322_v55 = vld [vmem:[%s1493_s16 + $0x78] sm:$0xff] }
 0x129   : > { %v701_v49 = vadd.f32 %v1412_v30, %v700_v46  ;;  %835 = vmatpush.bf16.msra.mxu1 %v1322_v55  ;;  %1363 = vmatpush.bf16.msra.mxu3 %v1322_v55 }
 0x12b   : > { %v1582_v52 = vsel %vm702_vm4, %v1412_v30, %v701_v49 }
 0x12c   : > { %651 = vmatpush.bf16.msra.mxu0 %v1310_v56  ;;  %1359 = vmatpush.bf16.msra.mxu2 %v1310_v56 }
 0x130   : > { %652 = vmatpush.bf16.msra.mxu0 %v1309_v57  ;;  %1360 = vmatpush.bf16.msra.mxu2 %v1309_v57 }
 0x134   : > { %653 = vmatpush.bf16.msra.mxu0 %v1308_v58  ;;  %1361 = vmatpush.bf16.msra.mxu2 %v1308_v58 }
 0x138   : > { %654 = vmatpush.bf16.msra.mxu0 %v1307_v59  ;;  %1362 = vmatpush.bf16.msra.mxu2 %v1307_v59 }
 0x13b   : > { %655 = vmatmul.bf16.vlgmr.msra.gmra.mxu0 %v578_v0  ;;  %665 = vmatmul.bf16.vlgmr.msra.gmra.mxu2 %v580_v1 }
 0x14b   : > { %660 = vmatmul.bf16.gmra.mxu0 %v579_v6  ;;  %670 = vmatmul.bf16.gmra.mxu2 %v581_v7  ;;  %v1321_v6 = vld [vmem:[%s1493_s16 + $0x70] sm:$0xff] }
 0x14c   : > { %836 = vmatpush.bf16.msra.mxu1 %v1321_v6  ;;  %1364 = vmatpush.bf16.msra.mxu3 %v1321_v6 }
 0x1b8   : > { %v656_v8 = vpop.f32.mrf.mxu0 }
 0x1b9   : > { %v657_v16 = vadd.f32 %v656_v8, %v598_v13 }
 0x1bb   : > { %v676_v20 = vmax.f32 %v657_v16, 0.0 }
 0x1be   : > { %v666_v9 = vpop.f32.mrf.mxu2 }
 0x1bf   : > { %v667_v24 = vadd.f32 %v666_v9, %v598_v13 }
 0x1c0   : > { %v658_v10 = vpop.f32.mrf.mxu0 }
 0x1c1   : > { %v659_v15 = vadd.f32 %v658_v10, %v598_v13  ;;  %v680_v31 = vmax.f32 %v667_v24, 0.0 }
 0x1c3   : > { %v677_v18 = vmax.f32 %v659_v15, 0.0 }
 0x1c5   : > { %v684_v25 = vadd.f32 %v677_v18, %v676_v20 }
 0x1c6   : > { %v668_v12 = vpop.f32.mrf.mxu2 }
 0x1c7   : > { %v669_v27 = vadd.f32 %v668_v12, %v598_v13 }
 0x1c8   : > { %v661_v14 = vpop.f32.mrf.mxu0 }
 0x1c9   : > { %v662_v17 = vadd.f32 %v661_v14, %v598_v13  ;;  %v681_v35 = vmax.f32 %v669_v27, 0.0  ;;  %v1320_v14 = vld [vmem:[%s1493_s16 + $0x68] sm:$0xff] }
 0x1ca   : > { %837 = vmatpush.bf16.msra.mxu1 %v1320_v14  ;;  %1365 = vmatpush.bf16.msra.mxu3 %v1320_v14 }
 0x1cb   : > { %v678_v21 = vmax.f32 %v662_v17, 0.0 }
 0x1cd   : > { %v685_v28 = vadd.f32 %v684_v25, %v678_v21 }
 0x1ce   : > { %v671_v19 = vpop.f32.mrf.mxu2 }
 0x1cf   : > { %v672_v32 = vadd.f32 %v671_v19, %v598_v13 }
 0x1d0   : > { %v663_v23 = vpop.f32.mrf.mxu0 }
 0x1d1   : > { %v664_v26 = vadd.f32 %v663_v23, %v598_v13  ;;  %v682_v39 = vmax.f32 %v672_v32, 0.0  ;;  %v1316_v32 = vld [vmem:[%s1493_s16 + $0x48] sm:$0xff] }
 0x1d3   : > { %v679_v29 = vmax.f32 %v664_v26, 0.0  ;;  %v1318_v26 = vld [vmem:[%s1493_s16 + $0x58] sm:$0xff] }
 0x1d5   : > { %v686_v33 = vadd.f32 %v685_v28, %v679_v29 }
 0x1d6   : > { %v673_v34 = vpop.f32.mrf.mxu2 }
 0x1d7   : > { %v687_v36 = vadd.f32 %v686_v33, %v680_v31  ;;  %v674_v37 = vadd.f32 %v673_v34, %v598_v13  ;;  %v1315_v34 = vld [vmem:[%s1493_s16 + $0x40] sm:$0xff] }
 0x1d9   : > { %v688_v40 = vadd.f32 %v687_v36, %v681_v35  ;;  %v683_v41 = vmax.f32 %v674_v37, 0.0 }
 0x1db   : > { %v689_v42 = vadd.f32 %v688_v40, %v682_v39 }
 0x1dd   : > { %v690_v44 = vadd.f32 %v689_v42, %v683_v41 }
 0x1df   : > { %v691_v45 = vrot.slane %v690_v44, 4 }
 0x1e1   : > { %v692_v47 = vadd.f32 %v691_v45, %v690_v44 }
 0x1e3   : > { %v693_v48 = vrot.slane %v692_v47, 2 }
 0x1e5   : > { %v694_v50 = vadd.f32 %v693_v48, %v692_v47  ;;  %v756_v48 = vperm.slane %v1579_v11, 2 }
 0x1e7   : > { %v695_v51 = vrot.slane %v694_v50, 1 }
 0x1e9   : > { %v696_v53 = vadd.f32 %v695_v51, %v694_v50 }
 0x1eb   : > { %v704_v54 = vmul.f32 %v1582_v52, %v696_v53 }
 0x1ed   : > { %v1586_v56 = vsub.f32 %v676_v20, %v704_v54  ;;  %v1588_v57 = vsub.f32 %v677_v18, %v704_v54  ;;  %v1590_v58 = vsub.f32 %v678_v21, %v704_v54  ;;  %v1592_v59 = vsub.f32 %v679_v29, %v704_v54  ;;  %v1319_v21 = vld [vmem:[%s1493_s16 + $0x60] sm:$0xff]  ;;  %v1317_v29 = vld [vmem:[%s1493_s16 + $0x50] sm:$0xff] }
 0x1ee   : > { %v709_v7 = vsub.f32 %v680_v31, %v704_v54  ;;  %v710_v10 = vsub.f32 %v681_v35, %v704_v54  ;;  %v1604_v15 = vsub.f32 %v682_v39, %v704_v54  ;;  %v712_v18 = vsub.f32 %v683_v41, %v704_v54  ;;  %838 = vmatpush.bf16.msra.mxu1 %v1319_v21 }
 0x1ef   : > { %v713_v0 = vmul.f32 %v1586_v56, %v1586_v56  ;;  %v714_v1 = vmul.f32 %v1588_v57, %v1588_v57  ;;  %v715_v8 = vmul.f32 %v1590_v58, %v1590_v58  ;;  %v716_v12 = vmul.f32 %v1592_v59, %v1592_v59  ;;  %1366 = vmatpush.bf16.msra.mxu3 %v1319_v21 }
 0x1f0   : > { %v717_v16 = vmul.f32 %v709_v7, %v709_v7  ;;  %v718_v19 = vmul.f32 %v710_v10, %v710_v10  ;;  %v719_v22 = vmul.f32 %v1604_v15, %v1604_v15  ;;  %v720_v24 = vmul.f32 %v712_v18, %v712_v18 }
 0x1f1   : > { %v721_v9 = vadd.f32 %v714_v1, %v713_v0 }
 0x1f2   : > { %839 = vmatpush.bf16.msra.mxu1 %v1318_v26 }
 0x1f3   : > { %v722_v13 = vadd.f32 %v721_v9, %v715_v8  ;;  %1367 = vmatpush.bf16.msra.mxu3 %v1318_v26 }
 0x1f5   : > { %v723_v17 = vadd.f32 %v722_v13, %v716_v12 }
 0x1f6   : > { %840 = vmatpush.bf16.msra.mxu1 %v1317_v29 }
 0x1f7   : > { %v724_v20 = vadd.f32 %v723_v17, %v717_v16  ;;  %1368 = vmatpush.bf16.msra.mxu3 %v1317_v29 }
 0x1f9   : > { %v725_v23 = vadd.f32 %v724_v20, %v718_v19  ;;  %v786_v20 = vperm.slane %v1579_v11, 3 }
 0x1fa   : > { %841 = vmatpush.bf16.msra.mxu1 %v1316_v32 }
 0x1fb   : > { %v726_v25 = vadd.f32 %v725_v23, %v719_v22  ;;  %1369 = vmatpush.bf16.msra.mxu3 %v1316_v32 }
 0x1fd   : > { %v727_v27 = vadd.f32 %v726_v25, %v720_v24 }
 0x1fe   : > { %842 = vmatpush.bf16.msra.mxu1 %v1315_v34 }
 0x1ff   : > { %v728_v28 = vrot.slane %v727_v27, 4  ;;  %1370 = vmatpush.bf16.msra.mxu3 %v1315_v34 }
 0x201   : > { %v729_v30 = vadd.f32 %v728_v28, %v727_v27 }
 0x203   : > { %v730_v31 = vrot.slane %v729_v30, 2 }
 0x205   : > { %v731_v33 = vadd.f32 %v730_v31, %v729_v30 }
 0x207   : > { %v732_v35 = vrot.slane %v731_v33, 1 }
 0x209   : > { %v733_v36 = vadd.f32 %v732_v35, %v731_v33 }
 0x20b   : > { %v734_v37 = vmul.f32 %v733_v36, %v1582_v52 }
 0x20d   : > { %v735_v38 = vadd.f32 1e-05, %v734_v37 }
 0x20f   : > { %1413 = vrsqrt.f32 %v735_v38  ;;  %vm742_vm6 = vweird.f32 %v735_v38 }
 0x215   : > { %v1414_v39 = vpop.eup %1413 }
 0x216   : > { %v737_v40 = vmul.f32 %v1414_v39, %v735_v38  ;;  %vm743_vm5 = vweird.f32 %v1414_v39 }
 0x217   : > { %vm744_vm7 = vmor %vm742_vm6, %vm743_vm5 }
 0x218   : > { %v738_v41 = vmul.f32 %v1414_v39, %v737_v40 }
 0x21a   : > { %v739_v42 = vmul.f32 0.5, %v738_v41 }
 0x21c   : > { %v740_v43 = vsub.f32 1.5, %v739_v42 }
 0x21e   : > { %v741_v44 = vmul.f32 %v1414_v39, %v740_v43 }
 0x220   : > { %v745_v45 = vsel %vm744_vm7, %v1414_v39, %v741_v44 }
 0x221   : > { %v746_v46 = vmul.f32 %v745_v45, %v1579_v11 }
 0x223   : > { %v747_v47 = vperm.slane %v746_v46, 1 }
 0x225   : > { %v748_v49 = vmul.f32 %v747_v47, %v1586_v56  ;;  %v749_v50 = vmul.f32 %v747_v47, %v1588_v57  ;;  %v752_v51 = vmul.f32 %v747_v47, %v709_v7  ;;  %v753_v53 = vmul.f32 %v747_v47, %v710_v10 }
 0x226   : > { %v750_v54 = vmul.f32 %v747_v47, %v1590_v58  ;;  %v751_v55 = vmul.f32 %v747_v47, %v1592_v59  ;;  %v755_v56 = vmul.f32 %v747_v47, %v712_v18  ;;  %v754_v57 = vmul.f32 %v747_v47, %v1604_v15 }
 0x227   : > { %v757_v0 = vadd.f32 %v756_v48, %v748_v49  ;;  %v758_v1 = vadd.f32 %v756_v48, %v749_v50  ;;  %v761_v6 = vadd.f32 %v756_v48, %v752_v51  ;;  %v762_v8 = vadd.f32 %v756_v48, %v753_v53 }
 0x228   : > { %v759_v9 = vadd.f32 %v756_v48, %v750_v54  ;;  %v760_v12 = vadd.f32 %v756_v48, %v751_v55  ;;  %v763_v7 = vadd.f32 %v756_v48, %v754_v57  ;;  %v764_v10 = vadd.f32 %v756_v48, %v755_v56 }
 0x229   : > { %v765_v13 = vpack.c.bf16 %v758_v1, %v757_v0  ;;  %v767_v14 = vpack.c.bf16 %v762_v8, %v761_v6 }
 0x22a   : > { %v766_v16 = vpack.c.bf16 %v760_v12, %v759_v9  ;;  %v768_v17 = vpack.c.bf16 %v764_v10, %v763_v7 }
 0x22b   : > { %843 = vmatmul.bf16.vlgmr.msra.gmra.mxu1 %v765_v13  ;;  %853 = vmatmul.bf16.vlgmr.msra.gmra.mxu3 %v767_v14 }
 0x23b   : > { %848 = vmatmul.bf16.gmra.mxu1 %v766_v16  ;;  %858 = vmatmul.bf16.gmra.mxu3 %v768_v17 }
 0x2a8   : > { %v844_v58 = vpop.f32.mrf.mxu1 }
 0x2a9   : > { %v845_v24 = vadd.f32 %v844_v58, %v786_v20 }
 0x2ab   : > { %v864_v27 = vmax.f32 %v845_v24, 0.0 }
 0x2ae   : > { %v854_v59 = vpop.f32.mrf.mxu3 }
 0x2af   : > { %v855_v29 = vadd.f32 %v854_v59, %v786_v20 }
 0x2b0   : > { %v846_v19 = vpop.f32.mrf.mxu1 }
 0x2b1   : > { %v847_v23 = vadd.f32 %v846_v19, %v786_v20  ;;  %v868_v35 = vmax.f32 %v855_v29, 0.0 }
 0x2b3   : > { %v865_v26 = vmax.f32 %v847_v23, 0.0 }
 0x2b5   : > { %v872_v30 = vadd.f32 %v865_v26, %v864_v27 }
 0x2b6   : > { %v856_v21 = vpop.f32.mrf.mxu3 }
 0x2b7   : > { %v857_v32 = vadd.f32 %v856_v21, %v786_v20 }
 0x2b8   : > { %v849_v22 = vpop.f32.mrf.mxu1 }
 0x2b9   : > { %v850_v25 = vadd.f32 %v849_v22, %v786_v20  ;;  %v869_v38 = vmax.f32 %v857_v32, 0.0 }
 0x2bb   : > { %v866_v18 = vmax.f32 %v850_v25, 0.0 }
 0x2bd   : > { %v873_v33 = vadd.f32 %v872_v30, %v866_v18 }
 0x2be   : > { %v859_v28 = vpop.f32.mrf.mxu3 }
 0x2bf   : > { %v860_v36 = vadd.f32 %v859_v28, %v786_v20 }
 0x2c0   : > { %v851_v15 = vpop.f32.mrf.mxu1 }
 0x2c1   : > { %v852_v31 = vadd.f32 %v851_v15, %v786_v20  ;;  %v870_v42 = vmax.f32 %v860_v36, 0.0 }
 0x2c3   : > { %v867_v34 = vmax.f32 %v852_v31, 0.0 }
 0x2c5   : > { %v874_v37 = vadd.f32 %v873_v33, %v867_v34 }
 0x2c6   : > { %v861_v40 = vpop.f32.mrf.mxu3 }
 0x2c7   : > { %v875_v39 = vadd.f32 %v874_v37, %v868_v35  ;;  %v862_v41 = vadd.f32 %v861_v40, %v786_v20  ;;  %v937_v40 = vperm.slane %v1579_v11, 5 }
 0x2c9   : > { %v876_v43 = vadd.f32 %v875_v39, %v869_v38  ;;  %v871_v44 = vmax.f32 %v862_v41, 0.0 }
 0x2cb   : > { %v877_v45 = vadd.f32 %v876_v43, %v870_v42 }
 0x2cd   : > { %v878_v46 = vadd.f32 %v877_v45, %v871_v44 }
 0x2cf   : > { %v879_v47 = vrot.slane %v878_v46, 4 }
 0x2d1   : > { %v880_v48 = vadd.f32 %v879_v47, %v878_v46 }
 0x2d3   : > { %v881_v49 = vrot.slane %v880_v48, 2 }
 0x2d5   : > { %v882_v50 = vadd.f32 %v881_v49, %v880_v48 }
 0x2d7   : > { %v883_v51 = vrot.slane %v882_v50, 1 }
 0x2d9   : > { %v884_v53 = vadd.f32 %v883_v51, %v882_v50 }
 0x2db   : > { %v885_v54 = vmul.f32 %v884_v53, %v1582_v52 }
 0x2dd   : > { %v886_v55 = vsub.f32 %v864_v27, %v885_v54  ;;  %v887_v0 = vsub.f32 %v865_v26, %v885_v54  ;;  %v888_v1 = vsub.f32 %v866_v18, %v885_v54  ;;  %v889_v6 = vsub.f32 %v867_v34, %v885_v54 }
 0x2de   : > { %v890_v12 = vsub.f32 %v868_v35, %v885_v54  ;;  %v891_v16 = vsub.f32 %v869_v38, %v885_v54  ;;  %v892_v7 = vsub.f32 %v870_v42, %v885_v54  ;;  %v893_v58 = vsub.f32 %v871_v44, %v885_v54 }
 0x2df   : > { %v894_v8 = vmul.f32 %v886_v55, %v886_v55  ;;  %v895_v9 = vmul.f32 %v887_v0, %v887_v0  ;;  %v896_v13 = vmul.f32 %v888_v1, %v888_v1  ;;  %v897_v56 = vmul.f32 %v889_v6, %v889_v6 }
 0x2e0   : > { %v898_v10 = vmul.f32 %v890_v12, %v890_v12  ;;  %v899_v59 = vmul.f32 %v891_v16, %v891_v16  ;;  %v900_v20 = vmul.f32 %v892_v7, %v892_v7  ;;  %v901_v22 = vmul.f32 %v893_v58, %v893_v58 }
 0x2e1   : > { %v902_v14 = vadd.f32 %v895_v9, %v894_v8 }
 0x2e3   : > { %v903_v57 = vadd.f32 %v902_v14, %v896_v13 }
 0x2e5   : > { %v904_v17 = vadd.f32 %v903_v57, %v897_v56 }
 0x2e7   : > { %v905_v19 = vadd.f32 %v904_v17, %v898_v10 }
 0x2e9   : > { %v906_v21 = vadd.f32 %v905_v19, %v899_v59 }
 0x2eb   : > { %v907_v23 = vadd.f32 %v906_v21, %v900_v20 }
 0x2ed   : > { %v908_v24 = vadd.f32 %v907_v23, %v901_v22 }
 0x2ef   : > { %v909_v25 = vrot.slane %v908_v24, 4 }
 0x2f1   : > { %v910_v26 = vadd.f32 %v909_v25, %v908_v24 }
 0x2f3   : > { %v911_v27 = vrot.slane %v910_v26, 2 }
 0x2f5   : > { %v912_v18 = vadd.f32 %v911_v27, %v910_v26 }
 0x2f7   : > { %v913_v28 = vrot.slane %v912_v18, 1 }
 0x2f9   : > { %v914_v15 = vadd.f32 %v913_v28, %v912_v18 }
 0x2fb   : > { %v915_v29 = vmul.f32 %v914_v15, %v1582_v52 }
 0x2fd   : > { %v916_v30 = vadd.f32 1e-05, %v915_v29 }
 0x2ff   : > { %1415 = vrsqrt.f32 %v916_v30  ;;  %vm923_vm9 = vweird.f32 %v916_v30 }
 0x305   : > { %v1416_v31 = vpop.eup %1415 }
 0x306   : > { %v918_v32 = vmul.f32 %v1416_v31, %v916_v30  ;;  %vm924_vm8 = vweird.f32 %v1416_v31 }
 0x307   : > { %vm925_vm10 = vmor %vm923_vm9, %vm924_vm8 }
 0x308   : > { %v919_v33 = vmul.f32 %v1416_v31, %v918_v32 }
 0x30a   : > { %v920_v34 = vmul.f32 0.5, %v919_v33 }
 0x30c   : > { %v921_v35 = vsub.f32 1.5, %v920_v34 }
 0x30e   : > { %v922_v36 = vmul.f32 %v1416_v31, %v921_v35 }
 0x310   : > { %v926_v37 = vsel %vm925_vm10, %v1416_v31, %v922_v36 }
 0x311   : > { %v927_v38 = vmul.f32 %v926_v37, %v1579_v11 }
 0x313   : > { %v928_v39 = vperm.slane %v927_v38, 4 }
 0x315   : > { %v929_v41 = vmul.f32 %v928_v39, %v886_v55  ;;  %v930_v42 = vmul.f32 %v928_v39, %v887_v0  ;;  %v931_v52 = vmul.f32 %v928_v39, %v888_v1  ;;  %v932_v43 = vmul.f32 %v928_v39, %v889_v6 }
 0x316   : > { %v933_v44 = vmul.f32 %v928_v39, %v890_v12  ;;  %v934_v45 = vmul.f32 %v928_v39, %v891_v16  ;;  %v935_v46 = vmul.f32 %v928_v39, %v892_v7  ;;  %v936_v47 = vmul.f32 %v928_v39, %v893_v58 }
 0x317   : > { %v938_v48 = vadd.f32 %v937_v40, %v929_v41  ;;  %v939_v49 = vadd.f32 %v937_v40, %v930_v42  ;;  %v940_v50 = vadd.f32 %v937_v40, %v931_v52  ;;  %v941_v51 = vadd.f32 %v937_v40, %v932_v43 }
 0x318   : > { %v942_v53 = vadd.f32 %v937_v40, %v933_v44  ;;  %v943_v54 = vadd.f32 %v937_v40, %v934_v45  ;;  %v944_v8 = vadd.f32 %v937_v40, %v935_v46  ;;  %v945_v55 = vadd.f32 %v937_v40, %v936_v47 }
 0x319   : > { %v946_v9 = vadd.f32 %v938_v48, %v1554_v60  ;;  %v947_v13 = vadd.f32 %v939_v49, %v1556_v61  ;;  %v948_v11 = vadd.f32 %v940_v50, %v1566_v2  ;;  %v949_v0 = vadd.f32 %v941_v51, %v1568_v3 }
 0x31a   : > { %v950_v1 = vadd.f32 %v942_v53, %v1558_v62  ;;  %v951_v6 = vadd.f32 %v943_v54, %v1560_v63  ;;  %v952_v12 = vadd.f32 %v944_v8, %v1570_v4  ;;  %v953_v14 = vadd.f32 %v945_v55, %v1572_v5 }
 0x31b   : > { %954 = vst [vmem:[#allocation2 + $0x30] sm:$0xff] %v946_v9 }
 0x31c   : > { %955 = vst [vmem:[#allocation2] sm:$0xff] %v947_v13 }
 0x31d   : > { %956 = vst [vmem:[#allocation2 + $0x18] sm:$0xff] %v948_v11 }
 0x31e   : > { %957 = vst [vmem:[#allocation2 + $0x10] sm:$0xff] %v949_v0  ;;  %965 = sbr.rel (%p1259_p5) target bundleno = 980 (0x3d4), region = 64 }
 0x31f   : > { %958 = vst [vmem:[#allocation2 + $0x8] sm:$0xff] %v950_v1 }
 0x320   : > { %959 = vst [vmem:[#allocation2 + $0x20] sm:$0xff] %v951_v6 }
 0x321   : > { %960 = vst [vmem:[#allocation2 + $0x28] sm:$0xff] %v952_v12 }
 0x322   : > { %961 = vst [vmem:[#allocation2 + $0x38] sm:$0xff] %v953_v14 }
 0x323   : > { %v1330_v60 = vld [vmem:[%s1696_s7 + $0x38] sm:$0xff]  ;;  %v1329_v61 = vld [vmem:[%s1696_s7 + $0x30] sm:$0xff]  ;;  %v1328_v62 = vld [vmem:[%s1696_s7 + $0x28] sm:$0xff] }
 0x324   : > { %1046 = vmatpush.bf16.msra.mxu0 %v1330_v60  ;;  %1371 = vmatpush.bf16.msra.mxu1 %v1330_v60  ;;  %v1327_v63 = vld [vmem:[%s1696_s7 + $0x20] sm:$0xff]  ;;  %v1326_v2 = vld [vmem:[%s1696_s7 + $0x18] sm:$0xff]  ;;  %v1325_v3 = vld [vmem:[%s1696_s7 + $0x10] sm:$0xff] }
 0x325   : > { %1372 = vmatpush.bf16.msra.mxu2 %v1330_v60  ;;  %1373 = vmatpush.bf16.msra.mxu3 %v1330_v60  ;;  %v1324_v4 = vld [vmem:[%s1696_s7 + $0x8] sm:$0xff]  ;;  %v1323_v5 = vld [vmem:[%s1696_s7] sm:$0xff]  ;;  %v966_v16 = vld [vmem:[#allocation2 + $0x30] sm:$0xff] }
 0x326   : > { %v967_v56 = vld [vmem:[#allocation2] sm:$0xff]  ;;  %v968_v57 = vld [vmem:[#allocation2 + $0x18] sm:$0xff]  ;;  %v969_v7 = vld [vmem:[#allocation2 + $0x10] sm:$0xff] }
 0x327   : > { %v970_v10 = vld [vmem:[#allocation2 + $0x8] sm:$0xff]  ;;  %v971_v17 = vld [vmem:[#allocation2 + $0x20] sm:$0xff]  ;;  %v974_v19 = vpack.c.bf16 %v967_v56, %v966_v16  ;;  %v975_v20 = vpack.c.bf16 %v969_v7, %v968_v57 }
 0x328   : > { %1047 = vmatpush.bf16.msra.mxu0 %v1329_v61  ;;  %1374 = vmatpush.bf16.msra.mxu1 %v1329_v61  ;;  %v972_v58 = vld [vmem:[#allocation2 + $0x28] sm:$0xff]  ;;  %v976_v21 = vpack.c.bf16 %v971_v17, %v970_v10  ;;  %v1417_v23 = vld [vmem:[%s1697_s8] ss:$0 sm:$0xff] }
 0x329   : > { %1375 = vmatpush.bf16.msra.mxu2 %v1329_v61  ;;  %1376 = vmatpush.bf16.msra.mxu3 %v1329_v61  ;;  %v973_v59 = vld [vmem:[#allocation2 + $0x38] sm:$0xff] }
 0x32a   : > { %v977_v22 = vpack.c.bf16 %v973_v59, %v972_v58 }
 0x32c   : > { %1048 = vmatpush.bf16.msra.mxu0 %v1328_v62  ;;  %1377 = vmatpush.bf16.msra.mxu1 %v1328_v62 }
 0x32d   : > { %1378 = vmatpush.bf16.msra.mxu2 %v1328_v62  ;;  %1379 = vmatpush.bf16.msra.mxu3 %v1328_v62 }
 0x330   : > { %1049 = vmatpush.bf16.msra.mxu0 %v1327_v63  ;;  %1380 = vmatpush.bf16.msra.mxu1 %v1327_v63 }
 0x331   : > { %1381 = vmatpush.bf16.msra.mxu2 %v1327_v63  ;;  %1382 = vmatpush.bf16.msra.mxu3 %v1327_v63 }
 0x334   : > { %1050 = vmatpush.bf16.msra.mxu0 %v1326_v2  ;;  %1383 = vmatpush.bf16.msra.mxu1 %v1326_v2 }
 0x335   : > { %1384 = vmatpush.bf16.msra.mxu2 %v1326_v2  ;;  %1385 = vmatpush.bf16.msra.mxu3 %v1326_v2 }
 0x338   : > { %1051 = vmatpush.bf16.msra.mxu0 %v1325_v3  ;;  %1386 = vmatpush.bf16.msra.mxu1 %v1325_v3 }
 0x339   : > { %1387 = vmatpush.bf16.msra.mxu2 %v1325_v3  ;;  %1388 = vmatpush.bf16.msra.mxu3 %v1325_v3 }
 0x33c   : > { %1052 = vmatpush.bf16.msra.mxu0 %v1324_v4  ;;  %1389 = vmatpush.bf16.msra.mxu1 %v1324_v4 }
 0x33d   : > { %1390 = vmatpush.bf16.msra.mxu2 %v1324_v4  ;;  %1391 = vmatpush.bf16.msra.mxu3 %v1324_v4 }
 0x340   : > { %1053 = vmatpush.bf16.msra.mxu0 %v1323_v5  ;;  %1392 = vmatpush.bf16.msra.mxu1 %v1323_v5 }
 0x341   : > { %1393 = vmatpush.bf16.msra.mxu2 %v1323_v5  ;;  %1394 = vmatpush.bf16.msra.mxu3 %v1323_v5 }
 0x343   : > { %1054 = vmatmul.bf16.vlgmr.msra.gmra.mxu0 %v974_v19  ;;  %1059 = vmatmul.bf16.vlgmr.msra.gmra.mxu1 %v975_v20 }
 0x344   : > { %1064 = vmatmul.bf16.vlgmr.msra.gmra.mxu2 %v976_v21  ;;  %1069 = vmatmul.bf16.vlgmr.msra.gmra.mxu3 %v977_v22 }
 0x3c0   : > { %v1055_v24 = vpop.f32.mrf.mxu0  ;;  %v1060_v25 = vpop.f32.mrf.mxu1 }
 0x3c1   : > { %v1056_v26 = vadd.f32 %v1417_v23, %v1055_v24  ;;  %v1061_v27 = vadd.f32 %v1417_v23, %v1060_v25 }
 0x3c3   : > { %1075 = vst [vmem:[%s1698_s9] sm:$0xff] %v1056_v26 }
 0x3c4   : > { %1077 = vst [vmem:[%s1698_s9 + $0x10] sm:$0xff] %v1061_v27 }
 0x3c7   : > { %v1065_v18 = vpop.f32.mrf.mxu2  ;;  %v1070_v28 = vpop.f32.mrf.mxu3 }
 0x3c8   : > { %v1066_v15 = vadd.f32 %v1417_v23, %v1065_v18  ;;  %v1071_v29 = vadd.f32 %v1417_v23, %v1070_v28  ;;  %v1057_v30 = vpop.f32.mrf.mxu0  ;;  %v1062_v31 = vpop.f32.mrf.mxu1 }
 0x3c9   : > { %v1058_v32 = vadd.f32 %v1417_v23, %v1057_v30  ;;  %v1063_v33 = vadd.f32 %v1417_v23, %v1062_v31 }
 0x3ca   : > { %1079 = vst [vmem:[%s1698_s9 + $0x20] sm:$0xff] %v1066_v15 }
 0x3cb   : > { %1081 = vst [vmem:[%s1698_s9 + $0x30] sm:$0xff] %v1071_v29 }
 0x3cc   : > { %1076 = vst [vmem:[%s1698_s9 + $0x8] sm:$0xff] %v1058_v32 }
 0x3cd   : > { %1078 = vst [vmem:[%s1698_s9 + $0x18] sm:$0xff] %v1063_v33 }
 0x3cf   : > { %v1067_v34 = vpop.f32.mrf.mxu2  ;;  %v1072_v35 = vpop.f32.mrf.mxu3 }
 0x3d0   : > { %v1068_v36 = vadd.f32 %v1417_v23, %v1067_v34  ;;  %v1073_v37 = vadd.f32 %v1417_v23, %v1072_v35 }
 0x3d2   : > { %1080 = vst [vmem:[%s1698_s9 + $0x28] sm:$0xff] %v1068_v36 }
 0x3d3   : > { %1082 = vst [vmem:[%s1698_s9 + $0x38] sm:$0xff] %v1073_v37 }
 0x3d4 PF: > { %s19_s30 = sadd.s32 1, %s1424_s30  }
 0x3d5   : > { %p16_p6 = scmp.ge.s32.totalorder %s19_s30, 5  }
 0x3d7   :  { %18 = sbr.rel (!%p16_p6) target bundleno = 1 (0x1), region = 94 }

</bundles_post_ra>
